<compile_context>
chip_gen: v7x
topology: tpu7x:2x2x1
jax: 0.10.0
libtpu: 0.0.40
codegen_flags: <defaults>
</compile_context>

<pallas_src>
import numpy as np
import jax
import jax.numpy as jnp
from jax.experimental import pallas as pl
from jax.experimental.pallas import tpu as pltpu


def _round_up(x, m):
    return ((x + m - 1) // m) * m


# ------------------------------------------------------------------ kernel ---
def pvem_kernel(x_ref, w1_ref, b1_ref, w2_ref, fv_ref, pred_ref):
    # x_ref   : [TB,   Cpad]   zero-padded, feature-concatenated input slab
    # w1_ref  : [Cpad, Fpad]   block-diagonal stack of all per-feature W1
    # b1_ref  : [1,    Fpad]   concatenated first-layer biases
    # w2_ref  : [Fpad, Cpad]   block-diagonal stack of all per-feature W2
    # fv_ref  : [TB,   Fpad]   fv for every feature, concatenated along lanes
    # pred_ref: [TB,   Cpad]   pred for every feature, concatenated along lanes
    fv = jnp.dot(x_ref[...], w1_ref[...],
                 preferred_element_type=jnp.float32) + b1_ref[...]
    fv_ref[...] = fv.astype(fv_ref.dtype)
    pred_ref[...] = jnp.dot(fv, w2_ref[...],
                            preferred_element_type=jnp.float32).astype(pred_ref.dtype)


# ----------------------------------------------------------------- prepack ---
def pvem_prepack(params, n_aux_classes, fv_dim):
    """One-time packing of per-feature weights into block-diagonal slabs.

    params: list of (W1 [C_i, F], b1 [F], W2 [F, C_i]) per feature.
    Returns a tuple consumed by pvem_forward.
    """
    n_features = len(n_aux_classes)
    offsets = np.concatenate([[0], np.cumsum(n_aux_classes)]).astype(int)
    ctot = int(offsets[-1])
    ftot = n_features * fv_dim
    cpad = _round_up(ctot, 128)   # lane-dense input / pred width
    fpad = _round_up(ftot, 128)   # lane-dense fv width

    w1bd = np.zeros((cpad, fpad), np.float32)
    b1cat = np.zeros((1, fpad), np.float32)
    w2bd = np.zeros((fpad, cpad), np.float32)
    for i in range(n_features):
        s, e = int(offsets[i]), int(offsets[i + 1])
        fs, fe = i * fv_dim, (i + 1) * fv_dim
        w1, b1, w2 = params[i]
        w1bd[s:e, fs:fe] = np.asarray(w1)
        b1cat[0, fs:fe] = np.asarray(b1)
        w2bd[fs:fe, s:e] = np.asarray(w2)

    return (jnp.asarray(w1bd), jnp.asarray(b1cat), jnp.asarray(w2bd),
            ctot, ftot, cpad, fpad)


# ----------------------------------------------------------------- wrapper ---
def pvem_forward(inputs, packed, n_aux_classes, fv_dim, *, batch_tile=None):
    """inputs: [B, sum(n_aux_classes)] float32.

    Returns (fv_all [B, n_features, fv_dim], pred_all [B, sum(n_aux_classes)]).
    """
    w1bd, b1cat, w2bd, ctot, ftot, cpad, fpad = packed
    n_features = len(n_aux_classes)
    B = inputs.shape[0]

    # Batch tile: sublane-aligned, capped so a step's working set (double
    # buffered x/fv/pred + resident weights) stays well inside scoped VMEM on
    # every generation (v7x has 64 MiB physical, 32 MiB default scoped).
    if batch_tile is None:
        budget = 24 * 1024 * 1024
        per_row = 2 * (cpad + fpad + cpad) * 4          # x + fv + pred, 2 buffers
        tb = max(8, min(_round_up(B, 8), (budget // per_row) // 8 * 8, 1024))
    else:
        tb = _round_up(batch_tile, 8)
    bpad = _round_up(B, tb)

    # Single zero-pad of the activations (one dynamic-update-slice, no
    # per-feature slicing).
    x = jnp.zeros((bpad, cpad), jnp.float32).at[:B, :ctot].set(inputs)

    grid = (bpad // tb,)
    fv_flat, pred_pad = pl.pallas_call(
        pvem_kernel,
        out_shape=(
            jax.ShapeDtypeStruct((bpad, fpad), jnp.float32),
            jax.ShapeDtypeStruct((bpad, cpad), jnp.float32),
        ),
        grid_spec=pltpu.PrefetchScalarGridSpec(
            num_scalar_prefetch=0,
            grid=grid,
            in_specs=[
                pl.BlockSpec((tb, cpad), lambda i: (i, 0)),
                pl.BlockSpec((cpad, fpad), lambda i: (0, 0)),   # resident weights
                pl.BlockSpec((1, fpad), lambda i: (0, 0)),
                pl.BlockSpec((fpad, cpad), lambda i: (0, 0)),
            ],
            out_specs=[
                pl.BlockSpec((tb, fpad), lambda i: (i, 0)),
                pl.BlockSpec((tb, cpad), lambda i: (i, 0)),
            ],
        ),
        compiler_params=pltpu.CompilerParams(
            dimension_semantics=("parallel",),   # batch tiles are independent
        ),
    )(x, w1bd, b1cat, w2bd)

    # fv_flat is already in [B, feature-major * fv_dim] order -> one reshape,
    # no transpose / HBM round-trip; pred is already concatenated per feature.
    fv_all = fv_flat[:B, :ftot].reshape(B, n_features, fv_dim)
    pred_all = pred_pad[:B, :ctot]
    return fv_all, pred_all


# -------------------------------------------------------------- param init ---
def init_pvem_params(key, n_aux_classes, fv_dim):
    """Deterministic glorot-uniform init; bias = 0."""
    params = []
    for c in n_aux_classes:
        k1, k2, key = jax.random.split(key, 3)
        lim1 = float(np.sqrt(6.0 / (c + fv_dim)))
        w1 = jax.random.uniform(k1, (c, fv_dim), jnp.float32, -lim1, lim1)
        b1 = jnp.zeros((fv_dim,), jnp.float32)
        lim2 = float(np.sqrt(6.0 / (fv_dim + c)))
        w2 = jax.random.uniform(k2, (fv_dim, c), jnp.float32, -lim2, lim2)
        params.append((w1, b1, w2))
    return params


# --------------------------------------------------------------- reference ---
def pvem_reference(inputs, params, n_aux_classes):
    offsets = np.concatenate([[0], np.cumsum(n_aux_classes)]).astype(int)
    fvs, preds = [], []
    for i in range(len(n_aux_classes)):
        s, e = int(offsets[i]), int(offsets[i + 1])
        w1, b1, w2 = params[i]
        fv = inputs[:, s:e] @ w1 + b1
        preds.append(fv @ w2)
        fvs.append(fv[:, None, :])
    return jnp.concatenate(fvs, axis=1), jnp.concatenate(preds, axis=1)


if __name__ == "__main__":
    # Small, forward-consistent shapes.
    B = 8
    fv_dim = 32
    n_aux_classes = [4, 6, 8]          # n_features = 3, total input dim = 18
    total = int(np.sum(n_aux_classes))

    key = jax.random.PRNGKey(0)
    kx, kp = jax.random.split(key)
    inputs = jax.random.normal(kx, (B, total), jnp.float32)
    params = init_pvem_params(kp, n_aux_classes, fv_dim)

    packed = pvem_prepack(params, n_aux_classes, fv_dim)   # one-time
    fv_all, pred_all = pvem_forward(inputs, packed, n_aux_classes, fv_dim)
    fv_all = jax.block_until_ready(fv_all)
    pred_all = jax.block_until_ready(pred_all)

    fv_ref, pred_ref = pvem_reference(inputs, params, n_aux_classes)
    assert fv_all.shape == (B, len(n_aux_classes), fv_dim)
    assert pred_all.shape == (B, total)
    np.testing.assert_allclose(np.asarray(fv_all), np.asarray(fv_ref), rtol=1e-5, atol=1e-5)
    np.testing.assert_allclose(np.asarray(pred_all), np.asarray(pred_ref), rtol=1e-5, atol=1e-5)

    print("KERNEL_OK")
</pallas_src>

<mosaic_0001>
module attributes {stable_mosaic.version = 11 : i64} {
  func.func @pvem_kernel(%arg0: i32, %arg1: memref<8x128xf32, #tpu.memory_space<vmem>>, %arg2: memref<128x128xf32, #tpu.memory_space<vmem>>, %arg3: memref<1x128xf32, #tpu.memory_space<vmem>>, %arg4: memref<128x128xf32, #tpu.memory_space<vmem>>, %arg5: memref<8x128xf32, #tpu.memory_space<vmem>>, %arg6: memref<8x128xf32, #tpu.memory_space<vmem>>) attributes {dimension_semantics = [#tpu.dimension_semantics<parallel>], iteration_bounds = array<i64: 1>, scalar_prefetch = 0 : i64, scratch_operands = 0 : i64, tpu.core_type = #tpu.core_type<tc>, window_params = [{transform_indices = @transform_0, window_bounds = array<i64: 8, 128>}, {pipeline_mode = #tpu.pipeline_mode<synchronous>, transform_indices = @transform_1, window_bounds = array<i64: 128, 128>}, {pipeline_mode = #tpu.pipeline_mode<synchronous>, transform_indices = @transform_2, window_bounds = array<i64: 1, 128>}, {pipeline_mode = #tpu.pipeline_mode<synchronous>, transform_indices = @transform_3, window_bounds = array<i64: 128, 128>}, {transform_indices = @transform_4, window_bounds = array<i64: 8, 128>}, {transform_indices = @transform_5, window_bounds = array<i64: 8, 128>}]} {
    %c0 = arith.constant 0 : index
    %c0_0 = arith.constant 0 : index
    %0 = vector.load %arg1[%c0, %c0_0] : memref<8x128xf32, #tpu.memory_space<vmem>>, vector<8x128xf32>
    %c0_1 = arith.constant 0 : index
    %c0_2 = arith.constant 0 : index
    %1 = vector.load %arg2[%c0_1, %c0_2] : memref<128x128xf32, #tpu.memory_space<vmem>>, vector<128x128xf32>
    %cst = arith.constant dense<0.000000e+00> : vector<8x128xf32>
    %2 = tpu.matmul %0, %1, %cst {dimension_numbers = #tpu.dot_dimension_numbers<[1], [0], [0], [1], [0, 0, 1, 1], [], []>} : vector<8x128xf32>, vector<128x128xf32>, vector<8x128xf32> -> vector<8x128xf32>
    %c0_3 = arith.constant 0 : index
    %c0_4 = arith.constant 0 : index
    %3 = vector.load %arg3[%c0_3, %c0_4] : memref<1x128xf32, #tpu.memory_space<vmem>>, vector<1x128xf32>
    %4 = vector.broadcast %3 : vector<1x128xf32> to vector<8x128xf32>
    %5 = arith.addf %2, %4 : vector<8x128xf32>
    %c0_5 = arith.constant 0 : index
    %c0_6 = arith.constant 0 : index
    %6 = vector.load %arg5[%c0_5, %c0_6] : memref<8x128xf32, #tpu.memory_space<vmem>>, vector<8x128xf32>
    tpu.vector_store %arg5[%c0_5, %c0_6], %5 {strides = array<i32>} : memref<8x128xf32, #tpu.memory_space<vmem>>, vector<8x128xf32>,
    %c0_7 = arith.constant 0 : index
    %c0_8 = arith.constant 0 : index
    %7 = vector.load %arg4[%c0_7, %c0_8] : memref<128x128xf32, #tpu.memory_space<vmem>>, vector<128x128xf32>
    %cst_9 = arith.constant dense<0.000000e+00> : vector<8x128xf32>
    %8 = tpu.matmul %5, %7, %cst_9 {dimension_numbers = #tpu.dot_dimension_numbers<[1], [0], [0], [1], [0, 0, 1, 1], [], []>} : vector<8x128xf32>, vector<128x128xf32>, vector<8x128xf32> -> vector<8x128xf32>
    %c0_10 = arith.constant 0 : index
    %c0_11 = arith.constant 0 : index
    %9 = vector.load %arg6[%c0_10, %c0_11] : memref<8x128xf32, #tpu.memory_space<vmem>>, vector<8x128xf32>
    tpu.vector_store %arg6[%c0_10, %c0_11], %8 {strides = array<i32>} : memref<8x128xf32, #tpu.memory_space<vmem>>, vector<8x128xf32>,
    return
  }
  func.func @transform_0(%arg0: i32) -> (i32, i32) {
    %c0_i32 = arith.constant 0 : i32
    %c0_i32_0 = arith.constant 0 : i32
    return %arg0, %c0_i32 : i32, i32
  }
  func.func @transform_1(%arg0: i32) -> (i32, i32) {
    %c0_i32 = arith.constant 0 : i32
    %c0_i32_0 = arith.constant 0 : i32
    %c0_i32_1 = arith.constant 0 : i32
    return %c0_i32, %c0_i32_0 : i32, i32
  }
  func.func @transform_2(%arg0: i32) -> (i32, i32) {
    %c0_i32 = arith.constant 0 : i32
    %c0_i32_0 = arith.constant 0 : i32
    %c0_i32_1 = arith.constant 0 : i32
    return %c0_i32, %c0_i32_0 : i32, i32
  }
  func.func @transform_3(%arg0: i32) -> (i32, i32) {
    %c0_i32 = arith.constant 0 : i32
    %c0_i32_0 = arith.constant 0 : i32
    %c0_i32_1 = arith.constant 0 : i32
    return %c0_i32, %c0_i32_0 : i32, i32
  }
  func.func @transform_4(%arg0: i32) -> (i32, i32) {
    %c0_i32 = arith.constant 0 : i32
    %c0_i32_0 = arith.constant 0 : i32
    return %arg0, %c0_i32 : i32, i32
  }
  func.func @transform_5(%arg0: i32) -> (i32, i32) {
    %c0_i32 = arith.constant 0 : i32
    %c0_i32_0 = arith.constant 0 : i32
    return %arg0, %c0_i32 : i32, i32
  }
}

</mosaic_0001>

<bundles_post_ra>
// kernel: tpu_custom_call.1
= control target key start
LH: loop header
LB: loop body
LE: loop exit
PB: predicated region body
PF: predicated region fallthrough
CT: control target
= control target key end

     0   :  { %11 = vsyncpa [#allocation3], 0  ;;  %s678_s0 = inlined_call_operand.hbm [shape: f32[8,128], index: 0, kind: input, shape index: {}]   ;;  %s679_s1 = inlined_call_operand.hbm [shape: f32[128,128], index: 1, kind: input, shape index: {}]   ;;  %s680_s2 = inlined_call_operand.vmem [shape: f32[1,128], index: 2, kind: input, shape index: {}]   ;;  %s681_s3 = inlined_call_operand.hbm [shape: f32[128,128], index: 3, kind: input, shape index: {}]   ;;  %s682_s4 = inlined_call_operand.hbm [shape: f32[8,128], index: 4, kind: output, shape index: {0}]   ;;  %s683_s5 = inlined_call_operand.hbm [shape: f32[8,128], index: 5, kind: output, shape index: {1}]  }
   0x1   :  { %12 = vsyncpa [#allocation6], 0 }
   0x2   :  { %13 = vsyncpa [#allocation4], 0 }
   0x3   :  { %14 = vsyncpa [#allocation10], 0  ;;  %s553_s18 = smov [#allocation5]   ;;  %s435_s22 = scalar_lea.hbm %s679_s1, 2048 }
   0x4   :  { %s30_s19 = sshll.u32 %s553_s18, 4  ;;  %p436_p0 = scmp.ne.s32.totalorder %s679_s1, %s435_s22  ;;  %s31_s19 = int_to_ptr.vmem [resolvable:$true] %s30_s19 }
   0x5   :  { %p439_p1 = scmp.lt.u32.totalorder %s435_s22, %s679_s1 }
   0x7   :  { %p441_p2 = pnand %p439_p1, %p436_p0 }
   0x9   :  { %444 = shalt.err (!%p441_p2)
}
   0xa   :  { %s445_s27 = scalar_lea.vmem %s31_s19, 2048  ;;  %p450_p4 = scmp.lt.s32.totalorder %s31_s19, %s31_s19 }
   0xb   :  { %p446_p3 = scmp.ne.s32.totalorder %s31_s19, %s445_s27  ;;  %p451_p5 = scmp.lt.s32.totalorder %s445_s27, %s445_s27 }
   0xd   :  { %p452_p6 = por %p451_p5, %p450_p4 }
   0xf   :  { %p453_p7 = pnand %p452_p6, %p446_p3 }
  0x11   :  { %456 = shalt.err (!%p453_p7)
}
  0x12   :  { %s554_s28 = smov 128   ;;  %s555_s29 = smov 8  }
  0x13   :  { %36 = dma.hbm_to_vmem [thread:$0]  %s679_s1, 2048, %s31_s19, [#allocation6], %s554_s28, %s554_s28, %s555_s29  }
  0x14   :  { %s556_s7 = smov [#allocation2]   ;;  %s557_s9 = smov [#allocation7]  }
  0x15   :  { %s21_s8 = sshll.u32 %s556_s7, 4  ;;  %s44_s10 = sshll.u32 %s557_s9, 4  ;;  %s22_s8 = int_to_ptr.vmem [resolvable:$true] %s21_s8  ;;  %s45_s10 = int_to_ptr.vmem [resolvable:$true] %s44_s10 }
  0x16   :  { %s457_s13 = scalar_lea.hbm %s678_s0, 128 }
  0x17   :  { %p458_p8 = scmp.ne.s32.totalorder %s678_s0, %s457_s13  ;;  %p461_p9 = scmp.lt.u32.totalorder %s457_s13, %s678_s0 }
  0x19   :  { %p463_p10 = pnand %p461_p9, %p458_p8 }
  0x1b   :  { %466 = shalt.err (!%p463_p10)
}
  0x1c   :  { %s467_s1 = scalar_lea.vmem %s22_s8, 128  ;;  %p472_p12 = scmp.lt.s32.totalorder %s22_s8, %s22_s8 }
  0x1d   :  { %p468_p11 = scmp.ne.s32.totalorder %s22_s8, %s467_s1  ;;  %p473_p13 = scmp.lt.s32.totalorder %s467_s1, %s467_s1 }
  0x1f   :  { %p474_p0 = por %p473_p13, %p472_p12 }
  0x21   :  { %p475_p1 = pnand %p474_p0, %p468_p11 }
  0x23   :  { %478 = shalt.err (!%p475_p1)
}
  0x24   :  { %24 = dma.hbm_to_vmem [thread:$0]  %s678_s0, 128, %s22_s8, [#allocation3]  }
  0x25   :  { %s479_s22 = scalar_lea.hbm %s681_s3, 2048 }
  0x26   :  { %p480_p2 = scmp.ne.s32.totalorder %s681_s3, %s479_s22  ;;  %p483_p3 = scmp.lt.u32.totalorder %s479_s22, %s681_s3 }
  0x28   :  { %p485_p4 = pnand %p483_p3, %p480_p2 }
  0x2a   :  { %488 = shalt.err (!%p485_p4)
}
  0x2b   :  { %s489_s27 = scalar_lea.vmem %s45_s10, 2048  ;;  %p494_p6 = scmp.lt.s32.totalorder %s45_s10, %s45_s10 }
  0x2c   :  { %p490_p5 = scmp.ne.s32.totalorder %s45_s10, %s489_s27  ;;  %p495_p7 = scmp.lt.s32.totalorder %s489_s27, %s489_s27 }
  0x2e   :  { %p496_p8 = por %p495_p7, %p494_p6 }
  0x30   :  { %p497_p9 = pnand %p496_p8, %p490_p5 }
  0x32   :  { %500 = shalt.err (!%p497_p9)
}
  0x33   :  { %50 = dma.hbm_to_vmem [thread:$0]  %s681_s3, 2048, %s45_s10, [#allocation6], %s554_s28, %s554_s28, %s555_s29  }
  0x34   :  { %545 = dma.done.wait [#allocation3], 128  }
  0x35   :  { %546 = vsyncadd [#allocation3], 4294967168 }
  0x36   :  { %547 = dma.done.wait [#allocation6], 4096  }
  0x37   :  { %548 = vsyncadd [#allocation6], 4294963200  ;;  %v558_v0 = vmov 0.0|0.0   ;;  %vm559_vm0 = vmmov 0   ;;  %v560_v1 = vmov 0.0   ;;  %v61_v2 = vld [vmem:[#allocation5] sm:$0xff] }
  0x38   :  { %377 = vmatprep.subr.bf16.mxu0 %v558_v0  ;;  %339 = vmatprep.mubr.msk.f32.mxu0 %vm559_vm0, %v560_v1  ;;  %v62_v3 = vld [vmem:[#allocation5 + $0x8] sm:$0xff]  ;;  %v63_v4 = vld [vmem:[#allocation5 + $0x10] sm:$0xff]  ;;  %v64_v6 = vld [vmem:[#allocation5 + $0x18] sm:$0xff]  ;;  %s561_s29 = smov [#allocation8]  }
  0x39   :  { %401 = vmatprep.subr.bf16.mxu1 %v558_v0  ;;  %374 = vmatprep.mubr.msk.f32.mxu1 %vm559_vm0, %v560_v1  ;;  %v378_v5 = vpack.c.bf16 %v62_v3, %v61_v2  ;;  %v381_v7 = vpack.c.bf16 %v64_v6, %v63_v4  ;;  %v65_v8 = vld [vmem:[#allocation5 + $0x20] sm:$0xff]  ;;  %v66_v9 = vld [vmem:[#allocation5 + $0x28] sm:$0xff]  ;;  %v157_v12 = vld [vmem:[#allocation7 + $0x10] sm:$0xff]  ;;  %s248_s6 = sshll.u32 %s561_s29, 4  ;;  %s249_s6 = int_to_ptr.vmem [resolvable:$true] %s248_s6 }
  0x3a   :  { %v155_v10 = vld [vmem:[#allocation7] sm:$0xff]  ;;  %v156_v11 = vld [vmem:[#allocation7 + $0x8] sm:$0xff]  ;;  %v158_v13 = vld [vmem:[#allocation7 + $0x18] sm:$0xff]  ;;  %v384_v14 = vpack.c.bf16 %v66_v9, %v65_v8  ;;  %s501_s7 = scalar_lea.vmem %s249_s6, 128  ;;  %p506_p11 = scmp.lt.s32.totalorder %s249_s6, %s249_s6 }
  0x3b   :  { %379 = vmatpush3.bf16.msra.mxu0 %v378_v5  ;;  %v402_v15 = vpack.c.bf16 %v156_v11, %v155_v10  ;;  %v67_v16 = vld [vmem:[#allocation5 + $0x30] sm:$0xff]  ;;  %v68_v17 = vld [vmem:[#allocation5 + $0x38] sm:$0xff]  ;;  %v405_v18 = vpack.c.bf16 %v158_v13, %v157_v12  ;;  %v159_v19 = vld [vmem:[#allocation7 + $0x20] sm:$0xff]  ;;  %p502_p10 = scmp.ne.s32.totalorder %s249_s6, %s501_s7  ;;  %p507_p12 = scmp.lt.s32.totalorder %s501_s7, %s501_s7 }
  0x3c   :  { %380 = vmatprep.subr.bf16.mxu0 %v558_v0  ;;  %v160_v20 = vld [vmem:[#allocation7 + $0x28] sm:$0xff]  ;;  %v387_v21 = vpack.c.bf16 %v68_v17, %v67_v16  ;;  %v69_v22 = vld [vmem:[#allocation5 + $0x40] sm:$0xff]  ;;  %v161_v25 = vld [vmem:[#allocation7 + $0x30] sm:$0xff] }
  0x3d   :  { %403 = vmatpush3.bf16.msra.mxu1 %v402_v15  ;;  %v70_v23 = vld [vmem:[#allocation5 + $0x48] sm:$0xff]  ;;  %v408_v24 = vpack.c.bf16 %v160_v20, %v159_v19  ;;  %v162_v26 = vld [vmem:[#allocation7 + $0x38] sm:$0xff]  ;;  %v71_v28 = vld [vmem:[#allocation5 + $0x50] sm:$0xff]  ;;  %p508_p13 = por %p507_p12, %p506_p11 }
  0x3e   :  { %404 = vmatprep.subr.bf16.mxu1 %v558_v0  ;;  %v390_v27 = vpack.c.bf16 %v70_v23, %v69_v22  ;;  %v72_v29 = vld [vmem:[#allocation5 + $0x58] sm:$0xff]  ;;  %v411_v30 = vpack.c.bf16 %v162_v26, %v161_v25  ;;  %v163_v31 = vld [vmem:[#allocation7 + $0x40] sm:$0xff]  ;;  %v164_v32 = vld [vmem:[#allocation7 + $0x48] sm:$0xff] }
  0x3f   :  { %382 = vmatpush3.bf16.msra.mxu0 %v381_v7  ;;  %v393_v33 = vpack.c.bf16 %v72_v29, %v71_v28  ;;  %v73_v34 = vld [vmem:[#allocation5 + $0x60] sm:$0xff]  ;;  %v74_v35 = vld [vmem:[#allocation5 + $0x68] sm:$0xff]  ;;  %v414_v36 = vpack.c.bf16 %v164_v32, %v163_v31  ;;  %v165_v37 = vld [vmem:[#allocation7 + $0x50] sm:$0xff]  ;;  %p509_p0 = pnand %p508_p13, %p502_p10 }
  0x40   :  { %383 = vmatprep.subr.bf16.mxu0 %v558_v0  ;;  %v166_v38 = vld [vmem:[#allocation7 + $0x58] sm:$0xff]  ;;  %v396_v39 = vpack.c.bf16 %v74_v35, %v73_v34  ;;  %v75_v40 = vld [vmem:[#allocation5 + $0x70] sm:$0xff]  ;;  %v167_v43 = vld [vmem:[#allocation7 + $0x60] sm:$0xff] }
  0x41   :  { %406 = vmatpush3.bf16.msra.mxu1 %v405_v18  ;;  %v76_v41 = vld [vmem:[#allocation5 + $0x78] sm:$0xff]  ;;  %v417_v42 = vpack.c.bf16 %v166_v38, %v165_v37  ;;  %v168_v44 = vld [vmem:[#allocation7 + $0x68] sm:$0xff]  ;;  %v169_v48 = vld [vmem:[#allocation7 + $0x70] sm:$0xff] }
  0x42   :  { %407 = vmatprep.subr.bf16.mxu1 %v558_v0  ;;  %v399_v45 = vpack.c.bf16 %v76_v41, %v75_v40  ;;  %v420_v46 = vpack.c.bf16 %v168_v44, %v167_v43  ;;  %v60_v47 = vld [vmem:[#allocation2] sm:$0xff] }
  0x43   :  { %385 = vmatpush3.bf16.msra.mxu0 %v384_v14  ;;  %v170_v49 = vld [vmem:[#allocation7 + $0x78] sm:$0xff] }
  0x44   :  { %386 = vmatprep.subr.bf16.mxu0 %v558_v0  ;;  %v423_v50 = vpack.c.bf16 %v170_v49, %v169_v48  ;;  %v272_v51 = vld [vmem:[%s680_s2] ss:$0 sm:$0xff] }
  0x45   :  { %409 = vmatpush3.bf16.msra.mxu1 %v408_v24 }
  0x46   :  { %410 = vmatprep.subr.bf16.mxu1 %v558_v0 }
  0x47   :  { %388 = vmatpush3.bf16.msra.mxu0 %v387_v21 }
  0x48   :  { %389 = vmatprep.subr.bf16.mxu0 %v558_v0 }
  0x49   :  { %412 = vmatpush3.bf16.msra.mxu1 %v411_v30 }
  0x4a   :  { %413 = vmatprep.subr.bf16.mxu1 %v558_v0 }
  0x4b   :  { %391 = vmatpush3.bf16.msra.mxu0 %v390_v27 }
  0x4c   :  { %392 = vmatprep.subr.bf16.mxu0 %v558_v0 }
  0x4d   :  { %415 = vmatpush3.bf16.msra.mxu1 %v414_v36 }
  0x4e   :  { %416 = vmatprep.subr.bf16.mxu1 %v558_v0 }
  0x4f   :  { %394 = vmatpush3.bf16.msra.mxu0 %v393_v33 }
  0x50   :  { %395 = vmatprep.subr.bf16.mxu0 %v558_v0 }
  0x51   :  { %418 = vmatpush3.bf16.msra.mxu1 %v417_v42 }
  0x52   :  { %419 = vmatprep.subr.bf16.mxu1 %v558_v0 }
  0x53   :  { %397 = vmatpush3.bf16.msra.mxu0 %v396_v39 }
  0x54   :  { %398 = vmatprep.subr.bf16.mxu0 %v558_v0 }
  0x55   :  { %421 = vmatpush3.bf16.msra.mxu1 %v420_v46 }
  0x56   :  { %422 = vmatprep.subr.bf16.mxu1 %v558_v0 }
  0x57   :  { %400 = vmatpush3.bf16.msra.mxu0 %v399_v45 }
  0x59   :  { %424 = vmatpush3.bf16.msra.mxu1 %v423_v50 }
  0x5a   :  { %340 = vmatmul.mubr.f32.vlgmr.msra.gmra.mrb[0].mxu0 %v60_v47 }
 0x12d   :  { %v150_v52 = vpop.f32.mrb[0].mxu0 }
 0x12e   :  { %v151_v53 = vadd.f32 %v272_v51, %v150_v52  ;;  %v341_v54 = vpop.f32.mrb[1].mxu0 }
 0x130   :  { %154 = vst [vmem:[#allocation8] sm:$0xff] %v151_v53  ;;  %375 = vmatmul.mubr.f32.vlgmr.msra.gmra.mrb[0].mxu1 %v151_v53 }
 0x131   :  { %512 = shalt.err (!%p509_p0)
}
 0x132   :  { %s513_s10 = scalar_lea.hbm %s682_s4, 128 }
 0x133   :  { %p514_p1 = scmp.ne.s32.totalorder %s682_s4, %s513_s10  ;;  %p517_p2 = scmp.lt.u32.totalorder %s513_s10, %s682_s4 }
 0x135   :  { %p519_p3 = pnand %p517_p2, %p514_p1 }
 0x137   :  { %522 = shalt.err (!%p519_p3)
}
 0x138   :  { %251 = dma.vmem_to_hbm [thread:$0]  %s249_s6, 128, %s682_s4, [#allocation4]  }
 0x139   :  { %s562_s16 = smov [#allocation9]  }
 0x13a   :  { %s258_s17 = sshll.u32 %s562_s16, 4  ;;  %s259_s17 = int_to_ptr.vmem [resolvable:$true] %s258_s17 }
 0x13b   :  { %s523_s1 = scalar_lea.vmem %s259_s17, 128  ;;  %p528_p5 = scmp.lt.s32.totalorder %s259_s17, %s259_s17 }
 0x13c   :  { %p524_p4 = scmp.ne.s32.totalorder %s259_s17, %s523_s1  ;;  %p529_p6 = scmp.lt.s32.totalorder %s523_s1, %s523_s1 }
 0x13e   :  { %p530_p7 = por %p529_p6, %p528_p5 }
 0x140   :  { %p531_p8 = pnand %p530_p7, %p524_p4 }
 0x203   :  { %v237_v55 = vpop.f32.mrb[0].mxu1 }
 0x204   :  { %241 = vst [vmem:[#allocation9] sm:$0xff] %v237_v55  ;;  %v376_v56 = vpop.f32.mrb[1].mxu1 }
 0x205   :  { %534 = shalt.err (!%p531_p8)
}
 0x206   :  { %s535_s20 = scalar_lea.hbm %s683_s5, 128 }
 0x207   :  { %p536_p9 = scmp.ne.s32.totalorder %s683_s5, %s535_s20  ;;  %p539_p10 = scmp.lt.u32.totalorder %s535_s20, %s683_s5 }
 0x209   :  { %p541_p11 = pnand %p539_p10, %p536_p9 }
 0x20b   :  { %544 = shalt.err (!%p541_p11)
}
 0x20c   :  { %261 = dma.vmem_to_hbm [thread:$0]  %s259_s17, 128, %s683_s5, [#allocation10]  }
 0x20d   :  { %549 = dma.done.wait [#allocation4], 128  }
 0x20e   :  { %550 = vsyncadd [#allocation4], 4294967168 }
 0x20f   :  { %551 = dma.done.wait [#allocation10], 128  }
 0x210   :  { %552 = vsyncadd [#allocation10], 4294967168 }
 0x211   :  { %268 = vsyncpa [#allocation3], 1 }
 0x212   :  { %269 = vsyncpa [#allocation6], 1 }
 0x213   :  { %270 = vsyncpa [#allocation4], 1 }
 0x214   :  { %271 = vsyncpa [#allocation10], 1 }

</bundles_post_ra>
